<compile_context>
chip_gen: v6e
topology: v6e:2x2x1
jax: 0.10.0
libtpu: 0.0.40
codegen_flags: <defaults>
</compile_context>

<pallas_src>
import functools

import jax
import jax.numpy as jnp
from jax.experimental import pallas as pl
from jax.experimental.pallas import tpu as pltpu


def _round_up(x, m):
    return ((x + m - 1) // m) * m


def _gcn_kernel(x_ref, a_ref, w_ref, b_ref, o_ref, h_ref, *, order, support_len):
    """One grid step: Bn batch elements, full graph diffusion + 1x1-conv MLP.

    Layouts (V padded to a lane multiple, L padded to a sublane multiple):
      x_ref: (Bn, Lp, C, Vp)       a_ref: (S, Vp, Vp)
      w_ref: (c_out, C_big)        b_ref: (c_out, 1) f32
      o_ref: (Bn, Lp, c_out, Vp)   h_ref: VMEM scratch (Bn, Lp, C_big, Vp)
    """
    Bn, Lp, C, Vp = x_ref.shape
    c_out = o_ref.shape[2]
    cdt = h_ref.dtype  # compute dtype (f32 or bf16)

    # ---- Graph diffusion: h[:, :, k*C:(k+1)*C, :] holds the k-th term ------
    x = x_ref[...]                       # (Bn, Lp, C, Vp), already compute dtype
    h_ref[:, :, 0:C, :] = x              # term 0 is x itself

    # One big MXU matmul per diffusion step: (Bn*Lp*C, Vp) @ (Vp, Vp).
    cur0 = x.reshape(Bn * Lp * C, Vp)
    k = 1
    for s in range(support_len):         # static, small
        A = a_ref[s]                     # (Vp, Vp)
        cur = cur0                       # each support restarts from x
        for _ in range(order):
            cur = jnp.dot(cur, A, preferred_element_type=jnp.float32).astype(cdt)
            h_ref[:, :, k * C:(k + 1) * C, :] = cur.reshape(Bn, Lp, C, Vp)
            k += 1

    # ---- 1x1 conv (channel MLP) + bias --------------------------------------
    # Each (n, l) slice of h is a clean 2-D (C_big, Vp) slab, so the lane dim
    # (Vp) is never re-packed.  Bias add stays in f32 vregs (v5e-friendly).
    w = w_ref[...]                                        # (c_out, C_big)
    bias = jnp.broadcast_to(b_ref[...], (c_out, Vp))      # hoisted broadcast
    for n in range(Bn):                                   # static, small
        for l in range(Lp):
            h_nl = h_ref[n, l]                            # (C_big, Vp)
            out_nl = jnp.dot(w, h_nl, preferred_element_type=jnp.float32) + bias
            o_ref[n, l] = out_nl.astype(o_ref.dtype)
    # TODO(synk): dropout is applied as identity (eval mode); training-mode RNG
    # masking is not implemented here.


def _choose_block_n(n, per_batch_bytes, fixed_bytes, budget_bytes, max_bn=8):
    """Largest divisor of n that fits the VMEM budget, keeping >=2 grid steps
    when possible so both v7x TensorCores get work (no-op on v5e/v6e)."""
    best = 1
    for d in range(1, min(n, max_bn) + 1):
        if n % d != 0:
            continue
        fits = fixed_bytes + d * per_batch_bytes <= budget_bytes
        keeps_grid = (n // d >= 2) or (n == 1)
        if fits and keeps_grid:
            best = d
    return best


def gcn_forward(x, supports, weight, bias, *, order=2,
                compute_dtype=jnp.float32,
                vmem_budget_bytes=24 * 1024 * 1024):
    """x: (N, C, V, L) f32, supports: (S, V, V), weight: (c_out, C_big), bias: (c_out,)."""
    N, C, V, L = x.shape
    S = supports.shape[0]
    c_out, C_big = weight.shape
    assert C_big == (order * S + 1) * C

    Vp = max(128, _round_up(V, 128))     # lane-dense node axis
    Lp = max(8, _round_up(L, 8))         # sublane-aligned time axis

    # NCVL -> NLCV, zero-pad L and V, cast MXU operands to the compute dtype.
    x_t = jnp.transpose(x, (0, 3, 1, 2))                             # (N, L, C, V)
    x_t = jnp.pad(x_t, ((0, 0), (0, Lp - L), (0, 0), (0, Vp - V))).astype(compute_dtype)
    sup_p = jnp.pad(supports, ((0, 0), (0, Vp - V), (0, Vp - V))).astype(compute_dtype)
    w_c = weight.astype(compute_dtype)
    b2 = bias.reshape(c_out, 1).astype(jnp.float32)

    itemsize = jnp.dtype(compute_dtype).itemsize
    per_batch_bytes = (Lp * C * Vp * itemsize * 2          # x block, double-buffered
                       + Lp * c_out * Vp * 4 * 2           # out block, double-buffered
                       + Lp * C_big * Vp * itemsize)       # h scratch
    fixed_bytes = (S * Vp * Vp * itemsize * 2              # supports
                   + c_out * C_big * itemsize * 2          # weight
                   + c_out * 4 * 2)                        # bias
    Bn = _choose_block_n(N, per_batch_bytes, fixed_bytes, vmem_budget_bytes)

    kernel = functools.partial(_gcn_kernel, order=order, support_len=S)

    flops = int(N * (order * S * 2 * C * Lp * Vp * Vp + 2 * c_out * C_big * Lp * Vp))
    bytes_accessed = int(x_t.size * itemsize + sup_p.size * itemsize
                         + w_c.size * itemsize + N * Lp * c_out * Vp * 4)

    out_p = pl.pallas_call(
        kernel,
        out_shape=jax.ShapeDtypeStruct((N, Lp, c_out, Vp), jnp.float32),
        grid_spec=pltpu.PrefetchScalarGridSpec(
            num_scalar_prefetch=0,
            grid=(N // Bn,),
            in_specs=[
                pl.BlockSpec((Bn, Lp, C, Vp), lambda n: (n, 0, 0, 0)),
                pl.BlockSpec((S, Vp, Vp), lambda n: (0, 0, 0)),
                pl.BlockSpec((c_out, C_big), lambda n: (0, 0)),
                pl.BlockSpec((c_out, 1), lambda n: (0, 0)),
            ],
            out_specs=pl.BlockSpec((Bn, Lp, c_out, Vp), lambda n: (n, 0, 0, 0)),
            scratch_shapes=[pltpu.VMEM((Bn, Lp, C_big, Vp), compute_dtype)],
        ),
        compiler_params=pltpu.CompilerParams(
            dimension_semantics=("parallel",),
            vmem_limit_bytes=32 * 1024 * 1024,
        ),
        cost_estimate=pl.CostEstimate(
            flops=flops, transcendentals=0, bytes_accessed=bytes_accessed),
    )(x_t, sup_p, w_c, b2)

    # Strip padding and go back to NCVL.
    out = out_p[:, :L, :, :V]                      # (N, L, c_out, V)
    return jnp.transpose(out, (0, 2, 3, 1))        # (N, c_out, V, L)


def gcn_reference(x, supports, weight, bias, *, order=2):
    outs = [x]
    for s in range(supports.shape[0]):
        A = supports[s]
        x1 = x
        for _ in range(order):
            x1 = jnp.einsum("ncvl,vw->ncwl", x1, A)
            outs.append(x1)
    h = jnp.concatenate(outs, axis=1)               # (N, C_big, V, L)
    out = jnp.einsum("oc,ncvl->novl", weight, h) + bias[None, :, None, None]
    return out


if __name__ == "__main__":
    # Small shapes consistent with the module.
    N, C, V, L = 2, 4, 16, 8          # batch, channels, nodes, time
    support_len, order = 3, 2
    c_out = 8
    C_big = (order * support_len + 1) * C

    key = jax.random.PRNGKey(0)
    kx, ka, kw, kb = jax.random.split(key, 4)

    x = jax.random.normal(kx, (N, C, V, L), dtype=jnp.float32)
    supports = jax.random.uniform(ka, (support_len, V, V), dtype=jnp.float32)
    # row-normalize adjacencies (typical for Graph-WaveNet supports)
    supports = supports / jnp.sum(supports, axis=-1, keepdims=True)
    weight = 0.1 * jax.random.normal(kw, (c_out, C_big), dtype=jnp.float32)
    bias = 0.1 * jax.random.normal(kb, (c_out,), dtype=jnp.float32)

    ref = gcn_reference(x, supports, weight, bias, order=order)

    # f32 path (default; exact-ish vs. reference)
    out = jax.block_until_ready(gcn_forward(x, supports, weight, bias, order=order))
    if not bool(jnp.allclose(out, ref, atol=2e-4, rtol=2e-4)):
        raise AssertionError("Pallas gcn kernel (f32) mismatch vs reference")

    # bf16 MXU-operand path (v6e/v7x optimization; f32 accumulation + bias)
    out_bf16 = jax.block_until_ready(
        gcn_forward(x, supports, weight, bias, order=order,
                    compute_dtype=jnp.bfloat16))
    if not bool(jnp.allclose(out_bf16, ref, atol=5e-2, rtol=5e-2)):
        raise AssertionError("Pallas gcn kernel (bf16) mismatch vs reference")

    print("KERNEL_OK")
</pallas_src>

<mosaic_0001>
module attributes {stable_mosaic.version = 11 : i64} {
  func.func @_gcn_kernel(%arg0: i32, %arg1: memref<1x8x4x128xf32, #tpu.memory_space<vmem>>, %arg2: memref<3x128x128xf32, #tpu.memory_space<vmem>>, %arg3: memref<8x28xf32, #tpu.memory_space<vmem>>, %arg4: memref<8x1xf32, #tpu.memory_space<vmem>>, %arg5: memref<1x8x8x128xf32, #tpu.memory_space<vmem>>, %arg6: memref<1x8x28x128xf32, #tpu.memory_space<vmem>>) attributes {dimension_semantics = [#tpu.dimension_semantics<parallel>], iteration_bounds = array<i64: 2>, scalar_prefetch = 0 : i64, scratch_operands = 1 : i64, tpu.core_type = #tpu.core_type<tc>, window_params = [{transform_indices = @transform_0, window_bounds = array<i64: 1, 8, 4, 128>}, {pipeline_mode = #tpu.pipeline_mode<synchronous>, transform_indices = @transform_1, window_bounds = array<i64: 3, 128, 128>}, {pipeline_mode = #tpu.pipeline_mode<synchronous>, transform_indices = @transform_2, window_bounds = array<i64: 8, 28>}, {pipeline_mode = #tpu.pipeline_mode<synchronous>, transform_indices = @transform_3, window_bounds = array<i64: 8, 1>}, {transform_indices = @transform_4, window_bounds = array<i64: 1, 8, 8, 128>}]} {
    %c0 = arith.constant 0 : index
    %c0_0 = arith.constant 0 : index
    %c0_1 = arith.constant 0 : index
    %c0_2 = arith.constant 0 : index
    %0 = vector.load %arg1[%c0, %c0_0, %c0_1, %c0_2] : memref<1x8x4x128xf32, #tpu.memory_space<vmem>>, vector<1x8x4x128xf32>
    %c0_3 = arith.constant 0 : index
    %c0_4 = arith.constant 0 : index
    %c0_5 = arith.constant 0 : index
    %c0_6 = arith.constant 0 : index
    %1 = vector.load %arg6[%c0_3, %c0_4, %c0_5, %c0_6] : memref<1x8x28x128xf32, #tpu.memory_space<vmem>>, vector<1x8x4x128xf32>
    tpu.vector_store %arg6[%c0_3, %c0_4, %c0_5, %c0_6], %0 {strides = array<i32>} : memref<1x8x28x128xf32, #tpu.memory_space<vmem>>, vector<1x8x4x128xf32>,
    %2 = vector.shape_cast %0 : vector<1x8x4x128xf32> to vector<32x128xf32>
    %c0_7 = arith.constant 0 : index
    %c0_8 = arith.constant 0 : index
    %c0_9 = arith.constant 0 : index
    %3 = vector.load %arg2[%c0_7, %c0_8, %c0_9] : memref<3x128x128xf32, #tpu.memory_space<vmem>>, vector<1x128x128xf32>
    %4 = vector.shape_cast %3 : vector<1x128x128xf32> to vector<128x128xf32>
    %cst = arith.constant dense<0.000000e+00> : vector<32x128xf32>
    %5 = tpu.matmul %2, %4, %cst {dimension_numbers = #tpu.dot_dimension_numbers<[1], [0], [0], [1], [0, 0, 1, 1], [], []>} : vector<32x128xf32>, vector<128x128xf32>, vector<32x128xf32> -> vector<32x128xf32>
    %6 = vector.shape_cast %5 : vector<32x128xf32> to vector<1x8x4x128xf32>
    %c0_10 = arith.constant 0 : index
    %c0_11 = arith.constant 0 : index
    %c4 = arith.constant 4 : index
    %c0_12 = arith.constant 0 : index
    %7 = vector.load %arg6[%c0_10, %c0_11, %c4, %c0_12] : memref<1x8x28x128xf32, #tpu.memory_space<vmem>>, vector<1x8x4x128xf32>
    tpu.vector_store %arg6[%c0_10, %c0_11, %c4, %c0_12], %6 {strides = array<i32>} : memref<1x8x28x128xf32, #tpu.memory_space<vmem>>, vector<1x8x4x128xf32>,
    %cst_13 = arith.constant dense<0.000000e+00> : vector<32x128xf32>
    %8 = tpu.matmul %5, %4, %cst_13 {dimension_numbers = #tpu.dot_dimension_numbers<[1], [0], [0], [1], [0, 0, 1, 1], [], []>} : vector<32x128xf32>, vector<128x128xf32>, vector<32x128xf32> -> vector<32x128xf32>
    %9 = vector.shape_cast %8 : vector<32x128xf32> to vector<1x8x4x128xf32>
    %c0_14 = arith.constant 0 : index
    %c0_15 = arith.constant 0 : index
    %c8 = arith.constant 8 : index
    %c0_16 = arith.constant 0 : index
    %10 = vector.load %arg6[%c0_14, %c0_15, %c8, %c0_16] : memref<1x8x28x128xf32, #tpu.memory_space<vmem>>, vector<1x8x4x128xf32>
    tpu.vector_store %arg6[%c0_14, %c0_15, %c8, %c0_16], %9 {strides = array<i32>} : memref<1x8x28x128xf32, #tpu.memory_space<vmem>>, vector<1x8x4x128xf32>,
    %c1 = arith.constant 1 : index
    %c0_17 = arith.constant 0 : index
    %c0_18 = arith.constant 0 : index
    %11 = vector.load %arg2[%c1, %c0_17, %c0_18] : memref<3x128x128xf32, #tpu.memory_space<vmem>>, vector<1x128x128xf32>
    %12 = vector.shape_cast %11 : vector<1x128x128xf32> to vector<128x128xf32>
    %cst_19 = arith.constant dense<0.000000e+00> : vector<32x128xf32>
    %13 = tpu.matmul %2, %12, %cst_19 {dimension_numbers = #tpu.dot_dimension_numbers<[1], [0], [0], [1], [0, 0, 1, 1], [], []>} : vector<32x128xf32>, vector<128x128xf32>, vector<32x128xf32> -> vector<32x128xf32>
    %14 = vector.shape_cast %13 : vector<32x128xf32> to vector<1x8x4x128xf32>
    %c0_20 = arith.constant 0 : index
    %c0_21 = arith.constant 0 : index
    %c12 = arith.constant 12 : index
    %c0_22 = arith.constant 0 : index
    %15 = vector.load %arg6[%c0_20, %c0_21, %c12, %c0_22] : memref<1x8x28x128xf32, #tpu.memory_space<vmem>>, vector<1x8x4x128xf32>
    tpu.vector_store %arg6[%c0_20, %c0_21, %c12, %c0_22], %14 {strides = array<i32>} : memref<1x8x28x128xf32, #tpu.memory_space<vmem>>, vector<1x8x4x128xf32>,
    %cst_23 = arith.constant dense<0.000000e+00> : vector<32x128xf32>
    %16 = tpu.matmul %13, %12, %cst_23 {dimension_numbers = #tpu.dot_dimension_numbers<[1], [0], [0], [1], [0, 0, 1, 1], [], []>} : vector<32x128xf32>, vector<128x128xf32>, vector<32x128xf32> -> vector<32x128xf32>
    %17 = vector.shape_cast %16 : vector<32x128xf32> to vector<1x8x4x128xf32>
    %c0_24 = arith.constant 0 : index
    %c0_25 = arith.constant 0 : index
    %c16 = arith.constant 16 : index
    %c0_26 = arith.constant 0 : index
    %18 = vector.load %arg6[%c0_24, %c0_25, %c16, %c0_26] : memref<1x8x28x128xf32, #tpu.memory_space<vmem>>, vector<1x8x4x128xf32>
    tpu.vector_store %arg6[%c0_24, %c0_25, %c16, %c0_26], %17 {strides = array<i32>} : memref<1x8x28x128xf32, #tpu.memory_space<vmem>>, vector<1x8x4x128xf32>,
    %c2 = arith.constant 2 : index
    %c0_27 = arith.constant 0 : index
    %c0_28 = arith.constant 0 : index
    %19 = vector.load %arg2[%c2, %c0_27, %c0_28] : memref<3x128x128xf32, #tpu.memory_space<vmem>>, vector<1x128x128xf32>
    %20 = vector.shape_cast %19 : vector<1x128x128xf32> to vector<128x128xf32>
    %cst_29 = arith.constant dense<0.000000e+00> : vector<32x128xf32>
    %21 = tpu.matmul %2, %20, %cst_29 {dimension_numbers = #tpu.dot_dimension_numbers<[1], [0], [0], [1], [0, 0, 1, 1], [], []>} : vector<32x128xf32>, vector<128x128xf32>, vector<32x128xf32> -> vector<32x128xf32>
    %22 = vector.shape_cast %21 : vector<32x128xf32> to vector<1x8x4x128xf32>
    %c0_30 = arith.constant 0 : index
    %c0_31 = arith.constant 0 : index
    %c20 = arith.constant 20 : index
    %c0_32 = arith.constant 0 : index
    %23 = vector.load %arg6[%c0_30, %c0_31, %c20, %c0_32] : memref<1x8x28x128xf32, #tpu.memory_space<vmem>>, vector<1x8x4x128xf32>
    tpu.vector_store %arg6[%c0_30, %c0_31, %c20, %c0_32], %22 {strides = array<i32>} : memref<1x8x28x128xf32, #tpu.memory_space<vmem>>, vector<1x8x4x128xf32>,
    %cst_33 = arith.constant dense<0.000000e+00> : vector<32x128xf32>
    %24 = tpu.matmul %21, %20, %cst_33 {dimension_numbers = #tpu.dot_dimension_numbers<[1], [0], [0], [1], [0, 0, 1, 1], [], []>} : vector<32x128xf32>, vector<128x128xf32>, vector<32x128xf32> -> vector<32x128xf32>
    %25 = vector.shape_cast %24 : vector<32x128xf32> to vector<1x8x4x128xf32>
    %c0_34 = arith.constant 0 : index
    %c0_35 = arith.constant 0 : index
    %c24 = arith.constant 24 : index
    %c0_36 = arith.constant 0 : index
    %26 = vector.load %arg6[%c0_34, %c0_35, %c24, %c0_36] : memref<1x8x28x128xf32, #tpu.memory_space<vmem>>, vector<1x8x4x128xf32>
    tpu.vector_store %arg6[%c0_34, %c0_35, %c24, %c0_36], %25 {strides = array<i32>} : memref<1x8x28x128xf32, #tpu.memory_space<vmem>>, vector<1x8x4x128xf32>,
    %c0_37 = arith.constant 0 : index
    %c0_38 = arith.constant 0 : index
    %27 = vector.load %arg3[%c0_37, %c0_38] : memref<8x28xf32, #tpu.memory_space<vmem>>, vector<8x28xf32>
    %c0_39 = arith.constant 0 : index
    %c0_40 = arith.constant 0 : index
    %28 = vector.load %arg4[%c0_39, %c0_40] : memref<8x1xf32, #tpu.memory_space<vmem>>, vector<8x1xf32>
    %29 = vector.shape_cast %28 : vector<8x1xf32> to vector<8x1xf32>
    %30 = vector.broadcast %29 : vector<8x1xf32> to vector<8x128xf32>
    %c0_41 = arith.constant 0 : index
    %c0_42 = arith.constant 0 : index
    %c0_43 = arith.constant 0 : index
    %c0_44 = arith.constant 0 : index
    %31 = vector.load %arg6[%c0_41, %c0_42, %c0_43, %c0_44] : memref<1x8x28x128xf32, #tpu.memory_space<vmem>>, vector<1x1x28x128xf32>
    %32 = vector.shape_cast %31 : vector<1x1x28x128xf32> to vector<28x128xf32>
    %cst_45 = arith.constant dense<0.000000e+00> : vector<8x128xf32>
    %33 = tpu.matmul %27, %32, %cst_45 {dimension_numbers = #tpu.dot_dimension_numbers<[1], [0], [0], [1], [0, 0, 1, 1], [], []>} : vector<8x28xf32>, vector<28x128xf32>, vector<8x128xf32> -> vector<8x128xf32>
    %34 = arith.addf %33, %30 : vector<8x128xf32>
    %c0_46 = arith.constant 0 : index
    %c0_47 = arith.constant 0 : index
    %c0_48 = arith.constant 0 : index
    %c0_49 = arith.constant 0 : index
    %35 = vector.load %arg5[%c0_46, %c0_47, %c0_48, %c0_49] : memref<1x8x8x128xf32, #tpu.memory_space<vmem>>, vector<1x1x8x128xf32>
    %36 = vector.shape_cast %35 : vector<1x1x8x128xf32> to vector<8x128xf32>
    %37 = vector.shape_cast %34 : vector<8x128xf32> to vector<1x1x8x128xf32>
    tpu.vector_store %arg5[%c0_46, %c0_47, %c0_48, %c0_49], %37 {strides = array<i32>} : memref<1x8x8x128xf32, #tpu.memory_space<vmem>>, vector<1x1x8x128xf32>,
    %c0_50 = arith.constant 0 : index
    %c1_51 = arith.constant 1 : index
    %c0_52 = arith.constant 0 : index
    %c0_53 = arith.constant 0 : index
    %38 = vector.load %arg6[%c0_50, %c1_51, %c0_52, %c0_53] : memref<1x8x28x128xf32, #tpu.memory_space<vmem>>, vector<1x1x28x128xf32>
    %39 = vector.shape_cast %38 : vector<1x1x28x128xf32> to vector<28x128xf32>
    %cst_54 = arith.constant dense<0.000000e+00> : vector<8x128xf32>
    %40 = tpu.matmul %27, %39, %cst_54 {dimension_numbers = #tpu.dot_dimension_numbers<[1], [0], [0], [1], [0, 0, 1, 1], [], []>} : vector<8x28xf32>, vector<28x128xf32>, vector<8x128xf32> -> vector<8x128xf32>
    %41 = arith.addf %40, %30 : vector<8x128xf32>
    %c0_55 = arith.constant 0 : index
    %c1_56 = arith.constant 1 : index
    %c0_57 = arith.constant 0 : index
    %c0_58 = arith.constant 0 : index
    %42 = vector.load %arg5[%c0_55, %c1_56, %c0_57, %c0_58] : memref<1x8x8x128xf32, #tpu.memory_space<vmem>>, vector<1x1x8x128xf32>
    %43 = vector.shape_cast %42 : vector<1x1x8x128xf32> to vector<8x128xf32>
    %44 = vector.shape_cast %41 : vector<8x128xf32> to vector<1x1x8x128xf32>
    tpu.vector_store %arg5[%c0_55, %c1_56, %c0_57, %c0_58], %44 {strides = array<i32>} : memref<1x8x8x128xf32, #tpu.memory_space<vmem>>, vector<1x1x8x128xf32>,
    %c0_59 = arith.constant 0 : index
    %c2_60 = arith.constant 2 : index
    %c0_61 = arith.constant 0 : index
    %c0_62 = arith.constant 0 : index
    %45 = vector.load %arg6[%c0_59, %c2_60, %c0_61, %c0_62] : memref<1x8x28x128xf32, #tpu.memory_space<vmem>>, vector<1x1x28x128xf32>
    %46 = vector.shape_cast %45 : vector<1x1x28x128xf32> to vector<28x128xf32>
    %cst_63 = arith.constant dense<0.000000e+00> : vector<8x128xf32>
    %47 = tpu.matmul %27, %46, %cst_63 {dimension_numbers = #tpu.dot_dimension_numbers<[1], [0], [0], [1], [0, 0, 1, 1], [], []>} : vector<8x28xf32>, vector<28x128xf32>, vector<8x128xf32> -> vector<8x128xf32>
    %48 = arith.addf %47, %30 : vector<8x128xf32>
    %c0_64 = arith.constant 0 : index
    %c2_65 = arith.constant 2 : index
    %c0_66 = arith.constant 0 : index
    %c0_67 = arith.constant 0 : index
    %49 = vector.load %arg5[%c0_64, %c2_65, %c0_66, %c0_67] : memref<1x8x8x128xf32, #tpu.memory_space<vmem>>, vector<1x1x8x128xf32>
    %50 = vector.shape_cast %49 : vector<1x1x8x128xf32> to vector<8x128xf32>
    %51 = vector.shape_cast %48 : vector<8x128xf32> to vector<1x1x8x128xf32>
    tpu.vector_store %arg5[%c0_64, %c2_65, %c0_66, %c0_67], %51 {strides = array<i32>} : memref<1x8x8x128xf32, #tpu.memory_space<vmem>>, vector<1x1x8x128xf32>,
    %c0_68 = arith.constant 0 : index
    %c3 = arith.constant 3 : index
    %c0_69 = arith.constant 0 : index
    %c0_70 = arith.constant 0 : index
    %52 = vector.load %arg6[%c0_68, %c3, %c0_69, %c0_70] : memref<1x8x28x128xf32, #tpu.memory_space<vmem>>, vector<1x1x28x128xf32>
    %53 = vector.shape_cast %52 : vector<1x1x28x128xf32> to vector<28x128xf32>
    %cst_71 = arith.constant dense<0.000000e+00> : vector<8x128xf32>
    %54 = tpu.matmul %27, %53, %cst_71 {dimension_numbers = #tpu.dot_dimension_numbers<[1], [0], [0], [1], [0, 0, 1, 1], [], []>} : vector<8x28xf32>, vector<28x128xf32>, vector<8x128xf32> -> vector<8x128xf32>
    %55 = arith.addf %54, %30 : vector<8x128xf32>
    %c0_72 = arith.constant 0 : index
    %c3_73 = arith.constant 3 : index
    %c0_74 = arith.constant 0 : index
    %c0_75 = arith.constant 0 : index
    %56 = vector.load %arg5[%c0_72, %c3_73, %c0_74, %c0_75] : memref<1x8x8x128xf32, #tpu.memory_space<vmem>>, vector<1x1x8x128xf32>
    %57 = vector.shape_cast %56 : vector<1x1x8x128xf32> to vector<8x128xf32>
    %58 = vector.shape_cast %55 : vector<8x128xf32> to vector<1x1x8x128xf32>
    tpu.vector_store %arg5[%c0_72, %c3_73, %c0_74, %c0_75], %58 {strides = array<i32>} : memref<1x8x8x128xf32, #tpu.memory_space<vmem>>, vector<1x1x8x128xf32>,
    %c0_76 = arith.constant 0 : index
    %c4_77 = arith.constant 4 : index
    %c0_78 = arith.constant 0 : index
    %c0_79 = arith.constant 0 : index
    %59 = vector.load %arg6[%c0_76, %c4_77, %c0_78, %c0_79] : memref<1x8x28x128xf32, #tpu.memory_space<vmem>>, vector<1x1x28x128xf32>
    %60 = vector.shape_cast %59 : vector<1x1x28x128xf32> to vector<28x128xf32>
    %cst_80 = arith.constant dense<0.000000e+00> : vector<8x128xf32>
    %61 = tpu.matmul %27, %60, %cst_80 {dimension_numbers = #tpu.dot_dimension_numbers<[1], [0], [0], [1], [0, 0, 1, 1], [], []>} : vector<8x28xf32>, vector<28x128xf32>, vector<8x128xf32> -> vector<8x128xf32>
    %62 = arith.addf %61, %30 : vector<8x128xf32>
    %c0_81 = arith.constant 0 : index
    %c4_82 = arith.constant 4 : index
    %c0_83 = arith.constant 0 : index
    %c0_84 = arith.constant 0 : index
    %63 = vector.load %arg5[%c0_81, %c4_82, %c0_83, %c0_84] : memref<1x8x8x128xf32, #tpu.memory_space<vmem>>, vector<1x1x8x128xf32>
    %64 = vector.shape_cast %63 : vector<1x1x8x128xf32> to vector<8x128xf32>
    %65 = vector.shape_cast %62 : vector<8x128xf32> to vector<1x1x8x128xf32>
    tpu.vector_store %arg5[%c0_81, %c4_82, %c0_83, %c0_84], %65 {strides = array<i32>} : memref<1x8x8x128xf32, #tpu.memory_space<vmem>>, vector<1x1x8x128xf32>,
    %c0_85 = arith.constant 0 : index
    %c5 = arith.constant 5 : index
    %c0_86 = arith.constant 0 : index
    %c0_87 = arith.constant 0 : index
    %66 = vector.load %arg6[%c0_85, %c5, %c0_86, %c0_87] : memref<1x8x28x128xf32, #tpu.memory_space<vmem>>, vector<1x1x28x128xf32>
    %67 = vector.shape_cast %66 : vector<1x1x28x128xf32> to vector<28x128xf32>
    %cst_88 = arith.constant dense<0.000000e+00> : vector<8x128xf32>
    %68 = tpu.matmul %27, %67, %cst_88 {dimension_numbers = #tpu.dot_dimension_numbers<[1], [0], [0], [1], [0, 0, 1, 1], [], []>} : vector<8x28xf32>, vector<28x128xf32>, vector<8x128xf32> -> vector<8x128xf32>
    %69 = arith.addf %68, %30 : vector<8x128xf32>
    %c0_89 = arith.constant 0 : index
    %c5_90 = arith.constant 5 : index
    %c0_91 = arith.constant 0 : index
    %c0_92 = arith.constant 0 : index
    %70 = vector.load %arg5[%c0_89, %c5_90, %c0_91, %c0_92] : memref<1x8x8x128xf32, #tpu.memory_space<vmem>>, vector<1x1x8x128xf32>
    %71 = vector.shape_cast %70 : vector<1x1x8x128xf32> to vector<8x128xf32>
    %72 = vector.shape_cast %69 : vector<8x128xf32> to vector<1x1x8x128xf32>
    tpu.vector_store %arg5[%c0_89, %c5_90, %c0_91, %c0_92], %72 {strides = array<i32>} : memref<1x8x8x128xf32, #tpu.memory_space<vmem>>, vector<1x1x8x128xf32>,
    %c0_93 = arith.constant 0 : index
    %c6 = arith.constant 6 : index
    %c0_94 = arith.constant 0 : index
    %c0_95 = arith.constant 0 : index
    %73 = vector.load %arg6[%c0_93, %c6, %c0_94, %c0_95] : memref<1x8x28x128xf32, #tpu.memory_space<vmem>>, vector<1x1x28x128xf32>
    %74 = vector.shape_cast %73 : vector<1x1x28x128xf32> to vector<28x128xf32>
    %cst_96 = arith.constant dense<0.000000e+00> : vector<8x128xf32>
    %75 = tpu.matmul %27, %74, %cst_96 {dimension_numbers = #tpu.dot_dimension_numbers<[1], [0], [0], [1], [0, 0, 1, 1], [], []>} : vector<8x28xf32>, vector<28x128xf32>, vector<8x128xf32> -> vector<8x128xf32>
    %76 = arith.addf %75, %30 : vector<8x128xf32>
    %c0_97 = arith.constant 0 : index
    %c6_98 = arith.constant 6 : index
    %c0_99 = arith.constant 0 : index
    %c0_100 = arith.constant 0 : index
    %77 = vector.load %arg5[%c0_97, %c6_98, %c0_99, %c0_100] : memref<1x8x8x128xf32, #tpu.memory_space<vmem>>, vector<1x1x8x128xf32>
    %78 = vector.shape_cast %77 : vector<1x1x8x128xf32> to vector<8x128xf32>
    %79 = vector.shape_cast %76 : vector<8x128xf32> to vector<1x1x8x128xf32>
    tpu.vector_store %arg5[%c0_97, %c6_98, %c0_99, %c0_100], %79 {strides = array<i32>} : memref<1x8x8x128xf32, #tpu.memory_space<vmem>>, vector<1x1x8x128xf32>,
    %c0_101 = arith.constant 0 : index
    %c7 = arith.constant 7 : index
    %c0_102 = arith.constant 0 : index
    %c0_103 = arith.constant 0 : index
    %80 = vector.load %arg6[%c0_101, %c7, %c0_102, %c0_103] : memref<1x8x28x128xf32, #tpu.memory_space<vmem>>, vector<1x1x28x128xf32>
    %81 = vector.shape_cast %80 : vector<1x1x28x128xf32> to vector<28x128xf32>
    %cst_104 = arith.constant dense<0.000000e+00> : vector<8x128xf32>
    %82 = tpu.matmul %27, %81, %cst_104 {dimension_numbers = #tpu.dot_dimension_numbers<[1], [0], [0], [1], [0, 0, 1, 1], [], []>} : vector<8x28xf32>, vector<28x128xf32>, vector<8x128xf32> -> vector<8x128xf32>
    %83 = arith.addf %82, %30 : vector<8x128xf32>
    %c0_105 = arith.constant 0 : index
    %c7_106 = arith.constant 7 : index
    %c0_107 = arith.constant 0 : index
    %c0_108 = arith.constant 0 : index
    %84 = vector.load %arg5[%c0_105, %c7_106, %c0_107, %c0_108] : memref<1x8x8x128xf32, #tpu.memory_space<vmem>>, vector<1x1x8x128xf32>
    %85 = vector.shape_cast %84 : vector<1x1x8x128xf32> to vector<8x128xf32>
    %86 = vector.shape_cast %83 : vector<8x128xf32> to vector<1x1x8x128xf32>
    tpu.vector_store %arg5[%c0_105, %c7_106, %c0_107, %c0_108], %86 {strides = array<i32>} : memref<1x8x8x128xf32, #tpu.memory_space<vmem>>, vector<1x1x8x128xf32>,
    return
  }
  func.func @transform_0(%arg0: i32) -> (i32, i32, i32, i32) {
    %c0_i32 = arith.constant 0 : i32
    %c0_i32_0 = arith.constant 0 : i32
    %c0_i32_1 = arith.constant 0 : i32
    %c0_i32_2 = arith.constant 0 : i32
    return %arg0, %c0_i32, %c0_i32_0, %c0_i32_1 : i32, i32, i32, i32
  }
  func.func @transform_1(%arg0: i32) -> (i32, i32, i32) {
    %c0_i32 = arith.constant 0 : i32
    %c0_i32_0 = arith.constant 0 : i32
    %c0_i32_1 = arith.constant 0 : i32
    %c0_i32_2 = arith.constant 0 : i32
    return %c0_i32, %c0_i32_0, %c0_i32_1 : i32, i32, i32
  }
  func.func @transform_2(%arg0: i32) -> (i32, i32) {
    %c0_i32 = arith.constant 0 : i32
    %c0_i32_0 = arith.constant 0 : i32
    %c0_i32_1 = arith.constant 0 : i32
    return %c0_i32, %c0_i32_0 : i32, i32
  }
  func.func @transform_3(%arg0: i32) -> (i32, i32) {
    %c0_i32 = arith.constant 0 : i32
    %c0_i32_0 = arith.constant 0 : i32
    %c0_i32_1 = arith.constant 0 : i32
    return %c0_i32, %c0_i32_0 : i32, i32
  }
  func.func @transform_4(%arg0: i32) -> (i32, i32, i32, i32) {
    %c0_i32 = arith.constant 0 : i32
    %c0_i32_0 = arith.constant 0 : i32
    %c0_i32_1 = arith.constant 0 : i32
    %c0_i32_2 = arith.constant 0 : i32
    return %arg0, %c0_i32, %c0_i32_0, %c0_i32_1 : i32, i32, i32, i32
  }
}

</mosaic_0001>

<bundles_post_ra>
// kernel: tpu_custom_call.1
= control target key start
LH: loop header
LB: loop body
LE: loop exit
PB: predicated region body
PF: predicated region fallthrough
CT: control target
= control target key end

     0   :  { %9 = vsyncpa [#allocation4], 0  ;;  %s2954_s0 = inlined_call_operand.hbm [shape: f32[2,8,4,128], index: 0, kind: input, shape index: {}]   ;;  %s2955_s1 = inlined_call_operand.hbm [shape: f32[3,128,128], index: 1, kind: input, shape index: {}]   ;;  %s2956_s2 = inlined_call_operand.vmem [shape: f32[8,28], index: 2, kind: input, shape index: {}]   ;;  %s2957_s3 = inlined_call_operand.vmem [shape: f32[8,1], index: 3, kind: input, shape index: {}]   ;;  %s2958_s4 = inlined_call_operand.hbm [shape: f32[2,8,8,128], index: 4, kind: output, shape index: {}]  }
   0x1   :  { %11 = vsyncpa [#allocation4 + $0x1], 0 }
   0x2   :  { %12 = vsyncpa [#allocation7], 0 }
   0x3   :  { %13 = vsyncpa [#allocation5], 0 }
   0x4   :  { %15 = vsyncpa [#allocation5 + $0x1], 0  ;;  %s2439_s15 = smov 0   ;;  %s2441_s16 = smov 0  }
   0x5   :  { %s2443_s17 = smov 0   ;;  %s2445_s18 = smov 0  }
   0x6 LB: > { %s2460_s19 = sadd.s32 4294967295, %s2400_s18   ;;  %s1690_s20 = sadd.s32 4294967294, %s2400_s18   ;;  %s2400_s18 = sphi %s2445_s18, %s2980_s18   ;;  %s2396_s17 = sphi %s2443_s17, %s2979_s17   ;;  %s2392_s16 = sphi %s2441_s16, %s2978_s16   ;;  %s2388_s15 = sphi %s2439_s15, %s2977_s15  }
   0x7   : > { %p41_p0 = scmp.ne.s32.totalorder %s2392_s16, %s2388_s15  ;;  %p2959_p1 = scmp.eq.s32.totalorder %s2460_s19, 0 }
   0x8   : > { %p134_p3 = scmp.eq.s32.totalorder %s1690_s20, 1  ;;  %p1691_p5 = scmp.ge.s32.totalorder %s2400_s18, 1 }
   0x9   : > { %p2469_p4 = por %p2959_p1, %p41_p0  ;;  %p141_p7 = scmp.lt.s32.totalorder %s2400_s18, 3 }
   0xa   : > { %p2474_p6 = por %p134_p3, %p41_p0  ;;  %s2402_s24 = smov [#allocation6]  }
   0xb   : > { %s2963_s21 = scalar_select %p2469_p4, 1, 0 }
   0xc   : > { %s2964_s22 = scalar_select %p2474_p6, 1, 0 }
   0xd   : > { %p2479_p8 = pnand %p1691_p5, %p141_p7  ;;  %s153_s25 = sshll.u32 %s2402_s24, 4  ;;  %s154_s25 = int_to_ptr.vmem [resolvable:$true] %s153_s25 }
   0xe   : > { %s2493_s27 = sadd.s32 1, %s2400_s18   ;;  %s28_s28 = sadd.s32 1, %s2396_s17 }
   0xf   : > { %s2965_s23 = scalar_select %p2479_p8, 1, 0 }
  0x10   : > { %p2215_p9 = pneg %p2479_p8  ;;  %s25_s29 = ssub.s32 %s2400_s18, %s2493_s27 }
  0x11   : > { %s2289_s30 = scalar_lea.vmem %s154_s25, 6144  ;;  %p2297_p5 = scmp.lt.s32.totalorder %s154_s25, %s154_s25 }
  0x12   : > { %p2488_p11 = pnand %p2215_p9, %p2959_p1  ;;  %p2290_p13 = scmp.ne.s32.totalorder %s154_s25, %s2289_s30 }
  0x13   : > { %p2298_p7 = scmp.lt.s32.totalorder %s2289_s30, %s2289_s30 }
  0x14   : > { %p2280_p12 = pneg %p2488_p11 }
  0x15   : > { %p2299_p10 = por %p2298_p7, %p2297_p5 }
  0x16   : > { %p2292_p0 = pnand %p2290_p13, %p2280_p12 }
  0x18   : > { %p2293_p3 = pneg %p2292_p0 }
  0x1a   : > { %p2300_p2 = pnand %p2299_p10, %p2293_p3 }
  0x1c   : > { %2303 = shalt.err (!%p2300_p2)
}
  0x1d   : > { %s2403_s5 = smov 128   ;;  %s2404_s6 = smov 8  }
  0x1e   : > { %2218 = dma.hbm_to_vmem [thread:$0]  (!%p2488_p11), %s2955_s1, 6144, %s154_s25, [#allocation7], %s2403_s5, %s2403_s5, %s2404_s6  }
  0x1f   : > { %p26_p9 = scmp.eq.s32.totalorder %s25_s29, 0  ;;  %p35_p12 = scmp.ne.s32.totalorder %s2396_s17, %s2392_s16 }
  0x20   : > { %p36_p10 = scmp.eq.s32.totalorder %s2400_s18, 0  ;;  %p2228_p2 = scmp.lt.s32.totalorder %s2400_s18, 2 }
  0x21   : > { %s2510_s9 = scalar_select %p26_p9, %s2396_s17, %s28_s28  }
  0x22   : > { %p37_p13 = por %p36_p10, %p35_p12  ;;  %p2967_p0 = scmp.eq.s32.totalorder %s2460_s19, 1 }
  0x23   : > { %s173_s11 = sand.u32 1, %s2396_s17   ;;  %s1729_s12 = sshll.u32 %s2400_s18, 9 }
  0x24   : > { %p2514_p3 = por %p2967_p0, %p35_p12  ;;  %s1694_s13 = sshll.u32 %s173_s11, 5 }
  0x25   : > { %s2523_s24 = scalar_lea.hbm %s2954_s0, %s1729_s12  ;;  %s177_s25 = scalar_lea.vmem [#allocation3], %s1694_s13 }
  0x26   : > { %s2968_s10 = scalar_select %p2514_p3, 1, 0 }
  0x27   : > { %s184_s26 = sshll.u32 %s177_s25, 4  ;;  %p2525_p11 = pnand %p2228_p2, %p37_p13  ;;  %s2529_s26 = int_to_ptr.vmem [resolvable:$true] %s184_s26 }
  0x28   : > { %s2531_s29 = scalar_lea.sflag [#allocation4], %s173_s11  ;;  %s2304_s30 = scalar_lea.hbm %s2523_s24, 512 }
  0x29   : > { %p2305_p5 = scmp.ne.s32.totalorder %s2523_s24, %s2304_s30  ;;  %p2306_p7 = pneg %p2525_p11 }
  0x2a   : > { %s2309_s7 = scalar_lea.hbm %s2954_s0, 1024  ;;  %p2310_p10 = scmp.lt.s32.totalorder %s2523_s24, %s2954_s0 }
  0x2b   : > { %p2307_p9 = pnand %p2306_p7, %p2305_p5  ;;  %p2311_p2 = scmp.lt.s32.totalorder %s2309_s7, %s2304_s30 }
  0x2d   : > { %p2308_p12 = pneg %p2307_p9  ;;  %p2312_p13 = por %p2311_p2, %p2310_p10 }
  0x2f   : > { %p2313_p0 = pnand %p2312_p13, %p2308_p12 }
  0x31   : > { %2316 = shalt.err (!%p2313_p0)
}
  0x32   : > { %s2317_s11 = scalar_lea.vmem %s2529_s26, 512  ;;  %s2405_s13 = smov [#allocation3]  }
  0x33   : > { %p2318_p1 = scmp.ne.s32.totalorder %s2529_s26, %s2317_s11  ;;  %s2322_s14 = sshll.u32 %s2405_s13, 4  ;;  %s2323_s14 = int_to_ptr.vmem [resolvable:$false] %s2322_s14 }
  0x34   : > { %s2324_s20 = scalar_lea.vmem %s2323_s14, 1024  ;;  %p2325_p9 = scmp.lt.s32.totalorder %s2529_s26, %s2323_s14 }
  0x35   : > { %p2320_p6 = pnand %p2318_p1, %p2306_p7  ;;  %p2326_p3 = scmp.lt.s32.totalorder %s2324_s20, %s2317_s11 }
  0x37   : > { %p2321_p5 = pneg %p2320_p6  ;;  %p2327_p4 = por %p2326_p3, %p2325_p9 }
  0x39   : > { %p2328_p8 = pnand %p2327_p4, %p2321_p5 }
  0x3b   : > { %2331 = shalt.err (!%p2328_p8)
}
  0x3c   : > { %s2406_s25 = smov 64   ;;  %s2407_s30 = smov 4  }
  0x3d   : > { %2222 = dma.hbm_to_vmem [thread:$0]  (!%p2525_p11), %s2523_s24, 512, %s2529_s26, %s2531_s29, %s2406_s25, %s2406_s25, %s2407_s30  }
  0x3e   : > { %p2970_p1 = scmp.ne.s32.totalorder %s2965_s23, 0 }
  0x3f   : > { %s2555_s5 = sand.u32 (!%p2970_p1), 1, %s2392_s16   ;;  %p2971_p4 = scmp.ne.s32.totalorder (!%p2970_p1), %s2963_s21, 0 }
  0x40   : > { %196 = sbr.rel (%p2970_p1) target bundleno = 817 (0x331), region = 36  ;;  %s1698_s6 = sshll.u32 (!%p2970_p1), %s2555_s5, 5 }
  0x41   : > { %s199_s7 = scalar_lea.sflag (!%p2970_p1), [#allocation4], %s2555_s5  ;;  %s2559_s8 = scalar_lea.vmem (!%p2970_p1), [#allocation3], %s1698_s6 }
  0x45   : > { %2375 = dma.done.wait (%p2971_p4), %s199_s7, 512  }
  0x46   : > { %2377 = vsyncadd (%p2971_p4), %s199_s7, 4294966784  ;;  %p2972_p6 = scmp.eq.s32.totalorder %s2460_s19, 0 }
  0x48   : > { %2379 = dma.done.wait (%p2972_p6), [#allocation7], 6144   ;;  %p2973_p8 = pmov %p2972_p6 }
  0x49   : > { %v262_v0 = vld [vmem:[#allocation6 + $0x78] sm:$0xff]  ;;  %v261_v1 = vld [vmem:[#allocation6 + $0x70] sm:$0xff]  ;;  %v260_v2 = vld [vmem:[#allocation6 + $0x68] sm:$0xff]  ;;  %vm2409_vm0 = vmmov 0   ;;  %vm958_vm1 = vcmask 1043456   ;;  %vm954_vm2 = vcmask 228352  }
  0x4a   : > { %2381 = vsyncadd (%p2973_p8), [#allocation7], 4294961152  ;;  %1891 = vmatprep.subr.mxu0 %v262_v0  ;;  %1929 = vmatprep.subr.mxu1 %v262_v0  ;;  %v259_v3 = vld [vmem:[#allocation6 + $0x60] sm:$0xff]  ;;  %v258_v6 = vld [vmem:[#allocation6 + $0x58] sm:$0xff]  ;;  %s1700_s28 = sshll.u32 %s2555_s5, 6  ;;  %s1730_s12 = sshll.u32 %s2460_s19, 10 }
  0x4b   : > { %1892 = vmatpush3.msra.mxu0 %v262_v0  ;;  %1930 = vmatpush3.msra.mxu1 %v262_v0  ;;  %v231_v4 = vld [vmem:[%s2559_s8] sm:$0xf]  ;;  %v232_v5 = vld [vmem:[%s2559_s8 + $0x4] sm:$0xf]  ;;  %v2574_v8 = vld [vmem:[%s2559_s8 + $0x8] sm:$0xf]  ;;  %s2908_s20 = scalar_lea.hbm %s2958_s4, %s1730_s12 }
  0x4c   : > { %1893 = vmatprep.subr.mxu0 %v261_v1  ;;  %1931 = vmatprep.subr.mxu1 %v261_v1  ;;  %239 = vst [vmem:[#allocation2] sm:$0xf] %v231_v4  ;;  %240 = vst [vmem:[#allocation2 + $0x20] sm:$0xf] %v232_v5  ;;  %v2571_v7 = vcombine.low %v231_v4, %v232_v5  ;;  %v2577_v9 = vld [vmem:[%s2559_s8 + $0xc] sm:$0xf] }
  0x4d   : > { %1894 = vmatpush3.msra.mxu0 %v261_v1  ;;  %1932 = vmatpush3.msra.mxu1 %v261_v1  ;;  %241 = vst [vmem:[#allocation2 + $0x40] sm:$0xf] %v2574_v8  ;;  %242 = vst [vmem:[#allocation2 + $0x60] sm:$0xf] %v2577_v9  ;;  %v2582_v10 = vld [vmem:[%s2559_s8 + $0x10] sm:$0xf]  ;;  %v2600_v25 = vcombine.low %v2574_v8, %v2577_v9 }
  0x4e   : > { %1895 = vmatprep.subr.mxu0 %v260_v2  ;;  %1933 = vmatprep.subr.mxu1 %v260_v2  ;;  %v2585_v11 = vld [vmem:[%s2559_s8 + $0x14] sm:$0xf]  ;;  %243 = vst [vmem:[#allocation2 + $0x80] sm:$0xf] %v2582_v10  ;;  %v2591_v13 = vld [vmem:[%s2559_s8 + $0x18] sm:$0xf] }
  0x4f   : > { %1896 = vmatpush3.msra.mxu0 %v260_v2  ;;  %1934 = vmatpush3.msra.mxu1 %v260_v2  ;;  %v257_v12 = vld [vmem:[#allocation6 + $0x50] sm:$0xff]  ;;  %244 = vst [vmem:[#allocation2 + $0xa0] sm:$0xf] %v2585_v11  ;;  %v2594_v14 = vld [vmem:[%s2559_s8 + $0x1c] sm:$0xf]  ;;  %v256_v15 = vld [vmem:[#allocation6 + $0x48] sm:$0xff]  ;;  %v2606_v27 = vcombine.low %v2582_v10, %v2585_v11 }
  0x50   : > { %1897 = vmatprep.subr.mxu0 %v259_v3  ;;  %1935 = vmatprep.subr.mxu1 %v259_v3  ;;  %245 = vst [vmem:[#allocation2 + $0xc0] sm:$0xf] %v2591_v13  ;;  %246 = vst [vmem:[#allocation2 + $0xe0] sm:$0xf] %v2594_v14  ;;  %v255_v16 = vld [vmem:[#allocation6 + $0x40] sm:$0xff]  ;;  %v254_v17 = vld [vmem:[#allocation6 + $0x38] sm:$0xff]  ;;  %v2614_v29 = vcombine.low %v2591_v13, %v2594_v14 }
  0x51   : > { %1898 = vmatpush3.msra.mxu0 %v259_v3  ;;  %1923 = vmatprep.mubr.f32.mxu0 %v2571_v7  ;;  %v253_v18 = vld [vmem:[#allocation6 + $0x30] sm:$0xff]  ;;  %v252_v19 = vld [vmem:[#allocation6 + $0x28] sm:$0xff]  ;;  %v251_v20 = vld [vmem:[#allocation6 + $0x20] sm:$0xff]  ;;  %s2894_s29 = scalar_lea.vmem [#allocation8], %s1700_s28  ;;  %s1594_s25 = scalar_lea.sflag [#allocation5], %s2555_s5 }
  0x52   : > { %1899 = vmatprep.subr.mxu0 %v258_v6  ;;  %1936 = vmatpush3.msra.mxu1 %v259_v3  ;;  %v250_v21 = vld [vmem:[#allocation6 + $0x18] sm:$0xff]  ;;  %v249_v22 = vld [vmem:[#allocation6 + $0x10] sm:$0xff]  ;;  %v248_v23 = vld [vmem:[#allocation6 + $0x8] sm:$0xff]  ;;  %s1607_s11 = sshll.u32 %s2894_s29, 4  ;;  %p2974_p11 = scmp.ne.s32.totalorder %s2968_s10, 0  ;;  %s2910_s11 = int_to_ptr.vmem [resolvable:$true] %s1607_s11 }
  0x53   : > { %1900 = vmatpush3.msra.mxu0 %v258_v6  ;;  %1937 = vmatprep.subr.mxu1 %v258_v6  ;;  %v247_v24 = vld [vmem:[#allocation6] sm:$0xff]  ;;  %v2602_v26 = vld [vmem:[#allocation6 + $0xf8] sm:$0xff]  ;;  %v2608_v28 = vld [vmem:[#allocation6 + $0xf0] sm:$0xff]  ;;  %s2332_s19 = scalar_lea.vmem %s2910_s11, 1024  ;;  %s2411_s30 = smov [#allocation8]  }
  0x54   : > { %1901 = vmatprep.subr.mxu0 %v257_v12  ;;  %1938 = vmatpush3.msra.mxu1 %v258_v6  ;;  %v2618_v30 = vld [vmem:[#allocation6 + $0xe8] sm:$0xff]  ;;  %v2622_v31 = vld [vmem:[#allocation6 + $0xe0] sm:$0xff]  ;;  %v2628_v32 = vld [vmem:[#allocation6 + $0xd8] sm:$0xff]  ;;  %p2333_p3 = scmp.ne.s32.totalorder %s2910_s11, %s2332_s19  ;;  %s2336_s6 = sshll.u32 %s2411_s30, 4  ;;  %s2337_s6 = int_to_ptr.vmem [resolvable:$false] %s2336_s6 }
  0x55   : > { %1902 = vmatpush3.msra.mxu0 %v257_v12  ;;  %1939 = vmatprep.subr.mxu1 %v257_v12  ;;  %v2633_v33 = vld [vmem:[#allocation6 + $0xd0] sm:$0xff]  ;;  %v2637_v34 = vld [vmem:[#allocation6 + $0xc8] sm:$0xff]  ;;  %v2641_v35 = vld [vmem:[#allocation6 + $0xc0] sm:$0xff]  ;;  %s2338_s7 = scalar_lea.vmem %s2337_s6, 2048  ;;  %p2339_p10 = scmp.lt.s32.totalorder %s2910_s11, %s2337_s6 }
  0x56   : > { %1903 = vmatprep.subr.mxu0 %v256_v15  ;;  %1940 = vmatpush3.msra.mxu1 %v257_v12  ;;  %v2645_v36 = vld [vmem:[#allocation6 + $0xb8] sm:$0xff]  ;;  %v2649_v37 = vld [vmem:[#allocation6 + $0xb0] sm:$0xff]  ;;  %v2653_v38 = vld [vmem:[#allocation6 + $0xa8] sm:$0xff]  ;;  %p2334_p7 = pnand %p2333_p3, %p2974_p11  ;;  %p2340_p2 = scmp.lt.s32.totalorder %s2338_s7, %s2332_s19 }
  0x57   : > { %1904 = vmatpush3.msra.mxu0 %v256_v15  ;;  %1941 = vmatprep.subr.mxu1 %v256_v15  ;;  %v2657_v39 = vld [vmem:[#allocation6 + $0xa0] sm:$0xff]  ;;  %v2661_v40 = vld [vmem:[#allocation6 + $0x98] sm:$0xff]  ;;  %v2665_v41 = vld [vmem:[#allocation6 + $0x90] sm:$0xff] }
  0x58   : > { %1905 = vmatprep.subr.mxu0 %v255_v16  ;;  %1942 = vmatpush3.msra.mxu1 %v256_v15  ;;  %v2669_v42 = vld [vmem:[#allocation6 + $0x88] sm:$0xff]  ;;  %v2673_v43 = vld [vmem:[#allocation6 + $0x80] sm:$0xff]  ;;  %v2677_v44 = vld [vmem:[#allocation6 + $0x178] sm:$0xff]  ;;  %p2335_p12 = pneg %p2334_p7  ;;  %p2341_p13 = por %p2340_p2, %p2339_p10 }
  0x59   : > { %1906 = vmatpush3.msra.mxu0 %v255_v16  ;;  %1943 = vmatprep.subr.mxu1 %v255_v16  ;;  %v2681_v45 = vld [vmem:[#allocation6 + $0x170] sm:$0xff]  ;;  %v2687_v46 = vld [vmem:[#allocation6 + $0x168] sm:$0xff]  ;;  %v2691_v47 = vld [vmem:[#allocation6 + $0x160] sm:$0xff] }
  0x5a   : > { %1907 = vmatprep.subr.mxu0 %v254_v17  ;;  %1944 = vmatpush3.msra.mxu1 %v255_v16  ;;  %v2696_v48 = vld [vmem:[#allocation6 + $0x158] sm:$0xff]  ;;  %v2701_v49 = vld [vmem:[#allocation6 + $0x150] sm:$0xff]  ;;  %v2705_v50 = vld [vmem:[#allocation6 + $0x148] sm:$0xff]  ;;  %p2342_p0 = pnand %p2341_p13, %p2335_p12 }
  0x5b   : > { %1908 = vmatpush3.msra.mxu0 %v254_v17  ;;  %1945 = vmatprep.subr.mxu1 %v254_v17  ;;  %v2709_v51 = vld [vmem:[#allocation6 + $0x140] sm:$0xff]  ;;  %v2713_v52 = vld [vmem:[#allocation6 + $0x138] sm:$0xff]  ;;  %v2717_v53 = vld [vmem:[#allocation6 + $0x130] sm:$0xff] }
  0x5c   : > { %1909 = vmatprep.subr.mxu0 %v253_v18  ;;  %1946 = vmatpush3.msra.mxu1 %v254_v17  ;;  %v2721_v54 = vld [vmem:[#allocation6 + $0x128] sm:$0xff]  ;;  %v2725_v55 = vld [vmem:[#allocation6 + $0x120] sm:$0xff]  ;;  %v2729_v56 = vld [vmem:[#allocation6 + $0x118] sm:$0xff] }
  0x5d   : > { %1910 = vmatpush3.msra.mxu0 %v253_v18  ;;  %1947 = vmatprep.subr.mxu1 %v253_v18  ;;  %v2733_v57 = vld [vmem:[#allocation6 + $0x110] sm:$0xff]  ;;  %v2737_v58 = vld [vmem:[#allocation6 + $0x108] sm:$0xff]  ;;  %v2741_v59 = vld [vmem:[#allocation6 + $0x100] sm:$0xff] }
  0x5e   : > { %1911 = vmatprep.subr.mxu0 %v252_v19  ;;  %1948 = vmatpush3.msra.mxu1 %v253_v18 }
  0x5f   : > { %1912 = vmatpush3.msra.mxu0 %v252_v19  ;;  %1949 = vmatprep.subr.mxu1 %v252_v19 }
  0x60   : > { %1913 = vmatprep.subr.mxu0 %v251_v20  ;;  %1950 = vmatpush3.msra.mxu1 %v252_v19 }
  0x61   : > { %1914 = vmatpush3.msra.mxu0 %v251_v20  ;;  %1951 = vmatprep.subr.mxu1 %v251_v20 }
  0x62   : > { %1915 = vmatprep.subr.mxu0 %v250_v21  ;;  %1952 = vmatpush3.msra.mxu1 %v251_v20  ;;  %v2408_v20 = vmov 0.0  }
  0x63   : > { %1916 = vmatpush3.msra.mxu0 %v250_v21  ;;  %1953 = vmatprep.subr.mxu1 %v250_v21 }
  0x64   : > { %1917 = vmatprep.subr.mxu0 %v249_v22  ;;  %1954 = vmatpush3.msra.mxu1 %v250_v21  ;;  %v944_v21 = vld [vmem:[%s2957_s3] sm:$0xff] }
  0x65   : > { %1918 = vmatpush3.msra.mxu0 %v249_v22  ;;  %1955 = vmatprep.subr.mxu1 %v249_v22 }
  0x66   : > { %1919 = vmatprep.subr.mxu0 %v248_v23  ;;  %1956 = vmatpush3.msra.mxu1 %v249_v22  ;;  %v2410_v22 = vmov 0  }
  0x67   : > { %1920 = vmatpush3.msra.mxu0 %v248_v23  ;;  %1957 = vmatprep.subr.mxu1 %v248_v23 }
  0x68   : > { %1921 = vmatprep.subr.mxu0 %v247_v24  ;;  %1958 = vmatpush3.msra.mxu1 %v248_v23 }
  0x69   : > { %1922 = vmatpush3.msra.mxu0 %v247_v24  ;;  %1959 = vmatprep.subr.mxu1 %v247_v24 }
  0x6a   : > { %1924 = vmatmul.mubr.f32.vlgmr.msra.gmra.mxu0 %v2600_v25  ;;  %1967 = vmatprep.subr.mxu0 %v2602_v26 }
  0x6b   : > { %1968 = vmatpush3.msra.mxu0 %v2602_v26  ;;  %1926 = vmatprep.mubr.f32.mxu0 %v2606_v27 }
  0x6c   : > { %1969 = vmatprep.subr.mxu0 %v2608_v28  ;;  %1960 = vmatpush3.msra.mxu1 %v247_v24 }
  0x6d   : > { %1970 = vmatpush3.msra.mxu0 %v2608_v28  ;;  %2005 = vmatprep.subr.mxu1 %v2602_v26 }
  0x6e   : > { %1927 = vmatmul.mubr.f32.gmra.mxu0 %v2614_v29  ;;  %1971 = vmatprep.subr.mxu0 %v2618_v30 }
  0x6f   : > { %1972 = vmatpush3.msra.mxu0 %v2618_v30  ;;  %1999 = vmatprep.mubr.f32.mxu0 %v2571_v7 }
  0x70   : > { %1973 = vmatprep.subr.mxu0 %v2622_v31  ;;  %2273 = vset.pattern.permute.xlu0 %v2410_v22 }
  0x71   : > { %1974 = vmatpush3.msra.mxu0 %v2622_v31  ;;  %947 = vperm.xlu0 %2273, %v944_v21  }
  0x72   : > { %1975 = vmatprep.subr.mxu0 %v2628_v32 }
  0x73   : > { %1976 = vmatpush3.msra.mxu0 %v2628_v32 }
  0x74   : > { %1977 = vmatprep.subr.mxu0 %v2633_v33 }
  0x75   : > { %1978 = vmatpush3.msra.mxu0 %v2633_v33 }
  0x76   : > { %1979 = vmatprep.subr.mxu0 %v2637_v34 }
  0x77   : > { %1980 = vmatpush3.msra.mxu0 %v2637_v34 }
  0x78   : > { %1981 = vmatprep.subr.mxu0 %v2641_v35 }
  0x79   : > { %1982 = vmatpush3.msra.mxu0 %v2641_v35 }
  0x7a   : > { %1983 = vmatprep.subr.mxu0 %v2645_v36 }
  0x7b   : > { %1984 = vmatpush3.msra.mxu0 %v2645_v36 }
  0x7c   : > { %1985 = vmatprep.subr.mxu0 %v2649_v37 }
  0x7d   : > { %1986 = vmatpush3.msra.mxu0 %v2649_v37 }
  0x7e   : > { %1987 = vmatprep.subr.mxu0 %v2653_v38 }
  0x7f   : > { %1988 = vmatpush3.msra.mxu0 %v2653_v38 }
  0x80   : > { %1989 = vmatprep.subr.mxu0 %v2657_v39 }
  0x81   : > { %1990 = vmatpush3.msra.mxu0 %v2657_v39 }
  0x82   : > { %1991 = vmatprep.subr.mxu0 %v2661_v40 }
  0x83   : > { %1992 = vmatpush3.msra.mxu0 %v2661_v40 }
  0x84   : > { %1993 = vmatprep.subr.mxu0 %v2665_v41 }
  0x85   : > { %1994 = vmatpush3.msra.mxu0 %v2665_v41 }
  0x86   : > { %1995 = vmatprep.subr.mxu0 %v2669_v42 }
  0x87   : > { %1996 = vmatpush3.msra.mxu0 %v2669_v42 }
  0x88   : > { %1997 = vmatprep.subr.mxu0 %v2673_v43 }
  0x89   : > { %1998 = vmatpush3.msra.mxu0 %v2673_v43 }
  0x8a   : > { %2000 = vmatmul.mubr.f32.vlgmr.msra.gmra.mxu0 %v2600_v25  ;;  %2043 = vmatprep.subr.mxu0 %v2677_v44 }
  0x8b   : > { %2044 = vmatpush3.msra.mxu0 %v2677_v44  ;;  %2002 = vmatprep.mubr.f32.mxu0 %v2606_v27 }
  0x8c   : > { %2045 = vmatprep.subr.mxu0 %v2681_v45 }
  0x8d   : > { %2046 = vmatpush3.msra.mxu0 %v2681_v45 }
  0x8e   : > { %2003 = vmatmul.mubr.f32.gmra.mxu0 %v2614_v29  ;;  %2047 = vmatprep.subr.mxu0 %v2687_v46 }
  0x8f   : > { %2048 = vmatpush3.msra.mxu0 %v2687_v46  ;;  %2075 = vmatprep.mubr.f32.mxu0 %v2571_v7 }
  0x90   : > { %2049 = vmatprep.subr.mxu0 %v2691_v47 }
  0x91   : > { %2050 = vmatpush3.msra.mxu0 %v2691_v47 }
  0x92   : > { %2051 = vmatprep.subr.mxu0 %v2696_v48 }
  0x93   : > { %2052 = vmatpush3.msra.mxu0 %v2696_v48 }
  0x94   : > { %2053 = vmatprep.subr.mxu0 %v2701_v49 }
  0x95   : > { %2054 = vmatpush3.msra.mxu0 %v2701_v49 }
  0x96   : > { %2055 = vmatprep.subr.mxu0 %v2705_v50 }
  0x97   : > { %2056 = vmatpush3.msra.mxu0 %v2705_v50 }
  0x98   : > { %2057 = vmatprep.subr.mxu0 %v2709_v51 }
  0x99   : > { %2058 = vmatpush3.msra.mxu0 %v2709_v51 }
  0x9a   : > { %2059 = vmatprep.subr.mxu0 %v2713_v52 }
  0x9b   : > { %2060 = vmatpush3.msra.mxu0 %v2713_v52 }
  0x9c   : > { %2061 = vmatprep.subr.mxu0 %v2717_v53 }
  0x9d   : > { %2062 = vmatpush3.msra.mxu0 %v2717_v53 }
  0x9e   : > { %2063 = vmatprep.subr.mxu0 %v2721_v54 }
  0x9f   : > { %2064 = vmatpush3.msra.mxu0 %v2721_v54 }
  0xa0   : > { %2065 = vmatprep.subr.mxu0 %v2725_v55 }
  0xa1   : > { %2066 = vmatpush3.msra.mxu0 %v2725_v55 }
  0xa2   : > { %2067 = vmatprep.subr.mxu0 %v2729_v56 }
  0xa3   : > { %2068 = vmatpush3.msra.mxu0 %v2729_v56 }
  0xa4   : > { %2069 = vmatprep.subr.mxu0 %v2733_v57 }
  0xa5   : > { %2070 = vmatpush3.msra.mxu0 %v2733_v57 }
  0xa6   : > { %2071 = vmatprep.subr.mxu0 %v2737_v58 }
  0xa7   : > { %2072 = vmatpush3.msra.mxu0 %v2737_v58 }
  0xa8   : > { %2073 = vmatprep.subr.mxu0 %v2741_v59 }
  0xa9   : > { %2074 = vmatpush3.msra.mxu0 %v2741_v59 }
  0xaa   : > { %2076 = vmatmul.mubr.f32.vlgmr.msra.gmra.mxu0 %v2600_v25  ;;  %2119 = vmatprep.subr.mxu0 %v2408_v20 }
  0xab   : > { %2078 = vmatprep.mubr.f32.mxu0 %v2606_v27 }
  0xae   : > { %2079 = vmatmul.mubr.f32.gmra.mxu0 %v2614_v29 }
  0xaf   : > { %2127 = vmatprep.mubr.msk.f32.mxu0 %vm2409_vm0, %v2408_v20 }
 0x12a   : > { %v1925_v60 = vpop.f32.mrf.mxu0 }
 0x12b   : > { %v369_v61 = vcombine.high %v1925_v60, %v1925_v60  ;;  %378 = vst [vmem:[#allocation2 + $0x44] sm:$0xf] %v1925_v60 }
 0x12c   : > { %v345_v62 = vpop.f32.mrf.mxu0 }
 0x12d   : > { %379 = vst [vmem:[#allocation2 + $0x64] sm:$0xf] %v369_v61  ;;  %v368_v63 = vcombine.high %v345_v62, %v345_v62  ;;  %376 = vst [vmem:[#allocation2 + $0x4] sm:$0xf] %v345_v62  ;;  %1961 = vmatprep.mubr.f32.mxu1 %v345_v62 }
 0x12e   : > { %v1928_v0 = vpop.f32.mrf.mxu0  ;;  %1962 = vmatmul.mubr.f32.vlgmr.msra.gmra.mxu1 %v1925_v60 }
 0x12f   : > { %377 = vst [vmem:[#allocation2 + $0x24] sm:$0xf] %v368_v63  ;;  %v371_v1 = vcombine.high %v1928_v0, %v1928_v0  ;;  %382 = vst [vmem:[#allocation2 + $0xc4] sm:$0xf] %v1928_v0  ;;  %2006 = vmatpush3.msra.mxu1 %v2602_v26 }
 0x130   : > { %v355_v2 = vpop.f32.mrf.mxu0  ;;  %2007 = vmatprep.subr.mxu1 %v2608_v28 }
 0x131   : > { %383 = vst [vmem:[#allocation2 + $0xe4] sm:$0xf] %v371_v1  ;;  %v370_v3 = vcombine.high %v355_v2, %v355_v2  ;;  %380 = vst [vmem:[#allocation2 + $0x84] sm:$0xf] %v355_v2  ;;  %1964 = vmatprep.mubr.f32.mxu1 %v355_v2  ;;  %2008 = vmatpush3.msra.mxu1 %v2608_v28 }
 0x132   : > { %1965 = vmatmul.mubr.f32.gmra.mxu1 %v1928_v0  ;;  %2009 = vmatprep.subr.mxu1 %v2618_v30  ;;  %v1114_v61 = vld [vmem:[#allocation2 + $0x40] sm:$0xff] }
 0x133   : > { %381 = vst [vmem:[#allocation2 + $0xa4] sm:$0xf] %v370_v3  ;;  %2010 = vmatpush3.msra.mxu1 %v2618_v30 }
 0x134   : > { %2011 = vmatprep.subr.mxu1 %v2622_v31  ;;  %v1194_v63 = vld [vmem:[#allocation2 + $0x60] sm:$0xff] }
 0x135   : > { %2012 = vmatpush3.msra.mxu1 %v2622_v31 }
 0x136   : > { %2013 = vmatprep.subr.mxu1 %v2628_v32 }
 0x137   : > { %2014 = vmatpush3.msra.mxu1 %v2628_v32 }
 0x138   : > { %2015 = vmatprep.subr.mxu1 %v2633_v33 }
 0x139   : > { %2016 = vmatpush3.msra.mxu1 %v2633_v33 }
 0x13a   : > { %2017 = vmatprep.subr.mxu1 %v2637_v34 }
 0x13b   : > { %2018 = vmatpush3.msra.mxu1 %v2637_v34 }
 0x13c   : > { %2019 = vmatprep.subr.mxu1 %v2641_v35 }
 0x13d   : > { %2020 = vmatpush3.msra.mxu1 %v2641_v35 }
 0x13e   : > { %2021 = vmatprep.subr.mxu1 %v2645_v36 }
 0x13f   : > { %2022 = vmatpush3.msra.mxu1 %v2645_v36 }
 0x140   : > { %2023 = vmatprep.subr.mxu1 %v2649_v37 }
 0x141   : > { %2024 = vmatpush3.msra.mxu1 %v2649_v37 }
 0x142   : > { %2025 = vmatprep.subr.mxu1 %v2653_v38 }
 0x143   : > { %2026 = vmatpush3.msra.mxu1 %v2653_v38 }
 0x144   : > { %2027 = vmatprep.subr.mxu1 %v2657_v39 }
 0x145   : > { %2028 = vmatpush3.msra.mxu1 %v2657_v39 }
 0x146   : > { %2029 = vmatprep.subr.mxu1 %v2661_v40 }
 0x147   : > { %2030 = vmatpush3.msra.mxu1 %v2661_v40 }
 0x148   : > { %2031 = vmatprep.subr.mxu1 %v2665_v41 }
 0x149   : > { %2032 = vmatpush3.msra.mxu1 %v2665_v41 }
 0x14a   : > { %v2001_v4 = vpop.f32.mrf.mxu0  ;;  %2033 = vmatprep.subr.mxu1 %v2669_v42 }
 0x14b   : > { %v596_v5 = vcombine.high %v2001_v4, %v2001_v4  ;;  %605 = vst [vmem:[#allocation2 + $0x4c] sm:$0xf] %v2001_v4  ;;  %2034 = vmatpush3.msra.mxu1 %v2669_v42 }
 0x14c   : > { %v572_v6 = vpop.f32.mrf.mxu0  ;;  %2035 = vmatprep.subr.mxu1 %v2673_v43 }
 0x14d   : > { %606 = vst [vmem:[#allocation2 + $0x6c] sm:$0xf] %v596_v5  ;;  %v595_v7 = vcombine.high %v572_v6, %v572_v6  ;;  %603 = vst [vmem:[#allocation2 + $0xc] sm:$0xf] %v572_v6  ;;  %2036 = vmatpush3.msra.mxu1 %v2673_v43  ;;  %2037 = vmatprep.mubr.f32.mxu1 %v572_v6  ;;  %v1274_v5 = vld [vmem:[#allocation2 + $0x80] sm:$0xff] }
 0x14e   : > { %v2004_v8 = vpop.f32.mrf.mxu0  ;;  %2038 = vmatmul.mubr.f32.vlgmr.msra.gmra.mxu1 %v2001_v4  ;;  %2081 = vmatprep.subr.mxu1 %v2677_v44 }
 0x14f   : > { %604 = vst [vmem:[#allocation2 + $0x2c] sm:$0xf] %v595_v7  ;;  %v598_v9 = vcombine.high %v2004_v8, %v2004_v8  ;;  %609 = vst [vmem:[#allocation2 + $0xcc] sm:$0xf] %v2004_v8  ;;  %2082 = vmatpush3.msra.mxu1 %v2677_v44  ;;  %v1354_v7 = vld [vmem:[#allocation2 + $0xa0] sm:$0xff] }
 0x150   : > { %v582_v10 = vpop.f32.mrf.mxu0  ;;  %2083 = vmatprep.subr.mxu1 %v2681_v45 }
 0x151   : > { %610 = vst [vmem:[#allocation2 + $0xec] sm:$0xf] %v598_v9  ;;  %v597_v11 = vcombine.high %v582_v10, %v582_v10  ;;  %607 = vst [vmem:[#allocation2 + $0x8c] sm:$0xf] %v582_v10  ;;  %2040 = vmatprep.mubr.f32.mxu1 %v582_v10  ;;  %2084 = vmatpush3.msra.mxu1 %v2681_v45 }
 0x152   : > { %2041 = vmatmul.mubr.f32.gmra.mxu1 %v2004_v8  ;;  %2085 = vmatprep.subr.mxu1 %v2687_v46 }
 0x153   : > { %608 = vst [vmem:[#allocation2 + $0xac] sm:$0xf] %v597_v11  ;;  %2086 = vmatpush3.msra.mxu1 %v2687_v46 }
 0x154   : > { %2087 = vmatprep.subr.mxu1 %v2691_v47 }
 0x155   : > { %2088 = vmatpush3.msra.mxu1 %v2691_v47 }
 0x156   : > { %2089 = vmatprep.subr.mxu1 %v2696_v48 }
 0x157   : > { %2090 = vmatpush3.msra.mxu1 %v2696_v48 }
 0x158   : > { %2091 = vmatprep.subr.mxu1 %v2701_v49 }
 0x159   : > { %2092 = vmatpush3.msra.mxu1 %v2701_v49 }
 0x15a   : > { %2093 = vmatprep.subr.mxu1 %v2705_v50 }
 0x15b   : > { %2094 = vmatpush3.msra.mxu1 %v2705_v50 }
 0x15c   : > { %2095 = vmatprep.subr.mxu1 %v2709_v51 }
 0x15d   : > { %2096 = vmatpush3.msra.mxu1 %v2709_v51 }
 0x15e   : > { %2097 = vmatprep.subr.mxu1 %v2713_v52 }
 0x15f   : > { %2098 = vmatpush3.msra.mxu1 %v2713_v52  ;;  %v950_v52 = vld [vmem:[#allocation2] sm:$0xff] }
 0x160   : > { %2099 = vmatprep.subr.mxu1 %v2717_v53 }
 0x161   : > { %2100 = vmatpush3.msra.mxu1 %v2717_v53 }
 0x162   : > { %2101 = vmatprep.subr.mxu1 %v2721_v54 }
 0x163   : > { %2102 = vmatpush3.msra.mxu1 %v2721_v54  ;;  %v2832_v54 = vld [vmem:[%s2956_s2] sm:$0xff] }
 0x164   : > { %2103 = vmatprep.subr.mxu1 %v2725_v55 }
 0x165   : > { %2104 = vmatpush3.msra.mxu1 %v2725_v55  ;;  %v1034_v55 = vld [vmem:[#allocation2 + $0x20] sm:$0xff] }
 0x166   : > { %2105 = vmatprep.subr.mxu1 %v2729_v56 }
 0x167   : > { %2106 = vmatpush3.msra.mxu1 %v2729_v56 }
 0x168   : > { %2107 = vmatprep.subr.mxu1 %v2733_v57 }
 0x169   : > { %2108 = vmatpush3.msra.mxu1 %v2733_v57 }
 0x16a   : > { %v2077_v12 = vpop.f32.mrf.mxu0  ;;  %2109 = vmatprep.subr.mxu1 %v2737_v58 }
 0x16b   : > { %v823_v13 = vcombine.high %v2077_v12, %v2077_v12  ;;  %832 = vst [vmem:[#allocation2 + $0x54] sm:$0xf] %v2077_v12  ;;  %2110 = vmatpush3.msra.mxu1 %v2737_v58 }
 0x16c   : > { %v799_v14 = vpop.f32.mrf.mxu0  ;;  %2111 = vmatprep.subr.mxu1 %v2741_v59 }
 0x16d   : > { %833 = vst [vmem:[#allocation2 + $0x74] sm:$0xf] %v823_v13  ;;  %v822_v15 = vcombine.high %v799_v14, %v799_v14  ;;  %830 = vst [vmem:[#allocation2 + $0x14] sm:$0xf] %v799_v14  ;;  %2112 = vmatpush3.msra.mxu1 %v2741_v59  ;;  %2113 = vmatprep.mubr.f32.mxu1 %v799_v14  ;;  %v1434_v13 = vld [vmem:[#allocation2 + $0xc0] sm:$0xff] }
 0x16e   : > { %2114 = vmatmul.mubr.f32.vlgmr.msra.gmra.mxu1 %v2077_v12  ;;  %v2080_v16 = vpop.f32.mrf.mxu0  ;;  %2130 = vmatprep.subr.mxu1 %v2408_v20 }
 0x16f   : > { %831 = vst [vmem:[#allocation2 + $0x34] sm:$0xf] %v822_v15  ;;  %v825_v17 = vcombine.high %v2080_v16, %v2080_v16  ;;  %836 = vst [vmem:[#allocation2 + $0xd4] sm:$0xf] %v2080_v16  ;;  %v1514_v15 = vld [vmem:[#allocation2 + $0xe0] sm:$0xff] }
 0x170   : > { %v809_v18 = vpop.f32.mrf.mxu0 }
 0x171   : > { %837 = vst [vmem:[#allocation2 + $0xf4] sm:$0xf] %v825_v17  ;;  %v824_v19 = vcombine.high %v809_v18, %v809_v18  ;;  %834 = vst [vmem:[#allocation2 + $0x94] sm:$0xf] %v809_v18  ;;  %2116 = vmatprep.mubr.f32.mxu1 %v809_v18 }
 0x172   : > { %2117 = vmatmul.mubr.f32.gmra.mxu1 %v2080_v16  ;;  %v948_v16 = vpop.permute.xlu0 %947 }
 0x173   : > { %835 = vst [vmem:[#allocation2 + $0xb4] sm:$0xf] %v824_v19  ;;  %2138 = vmatprep.mubr.msk.f32.mxu1 %vm2409_vm0, %v2408_v20 }
 0x1ee   : > { %v1963_v23 = vpop.f32.mrf.mxu1 }
 0x1ef   : > { %v474_v24 = vcombine.high %v1963_v23, %v1963_v23  ;;  %483 = vst [vmem:[#allocation2 + $0x48] sm:$0xf] %v1963_v23 }
 0x1f0   : > { %v450_v25 = vpop.f32.mrf.mxu1 }
 0x1f1   : > { %484 = vst [vmem:[#allocation2 + $0x68] sm:$0xf] %v474_v24  ;;  %v473_v26 = vcombine.high %v450_v25, %v450_v25  ;;  %481 = vst [vmem:[#allocation2 + $0x8] sm:$0xf] %v450_v25 }
 0x1f2   : > { %v1966_v27 = vpop.f32.mrf.mxu1 }
 0x1f3   : > { %482 = vst [vmem:[#allocation2 + $0x28] sm:$0xf] %v473_v26  ;;  %v476_v28 = vcombine.high %v1966_v27, %v1966_v27  ;;  %487 = vst [vmem:[#allocation2 + $0xc8] sm:$0xf] %v1966_v27 }
 0x1f4   : > { %v460_v29 = vpop.f32.mrf.mxu1 }
 0x1f5   : > { %488 = vst [vmem:[#allocation2 + $0xe8] sm:$0xf] %v476_v28  ;;  %v475_v30 = vcombine.high %v460_v29, %v460_v29  ;;  %485 = vst [vmem:[#allocation2 + $0x88] sm:$0xf] %v460_v29 }
 0x1f6   : > { %v1115_v59 = vld [vmem:[#allocation2 + $0x48] sm:$0xff] }
 0x1f7   : > { %486 = vst [vmem:[#allocation2 + $0xa8] sm:$0xf] %v475_v30 }
 0x1f8   : > { %v951_v50 = vld [vmem:[#allocation2 + $0x8] sm:$0xff] }
 0x1f9   : > { %v1195_v62 = vld [vmem:[#allocation2 + $0x68] sm:$0xff] }
 0x1fa   : > { %v1035_v53 = vld [vmem:[#allocation2 + $0x28] sm:$0xff] }
 0x1fb   : > { %v1435_v11 = vld [vmem:[#allocation2 + $0xc8] sm:$0xff] }
 0x1fc   : > { %v1275_v3 = vld [vmem:[#allocation2 + $0x88] sm:$0xff] }
 0x1fd   : > { %v1515_v14 = vld [vmem:[#allocation2 + $0xe8] sm:$0xff] }
 0x1fe   : > { %v1355_v6 = vld [vmem:[#allocation2 + $0xa8] sm:$0xff] }
 0x20e   : > { %v2039_v31 = vpop.f32.mrf.mxu1 }
 0x20f   : > { %v701_v32 = vcombine.high %v2039_v31, %v2039_v31  ;;  %710 = vst [vmem:[#allocation2 + $0x50] sm:$0xf] %v2039_v31 }
 0x210   : > { %v677_v33 = vpop.f32.mrf.mxu1 }
 0x211   : > { %711 = vst [vmem:[#allocation2 + $0x70] sm:$0xf] %v701_v32  ;;  %v700_v34 = vcombine.high %v677_v33, %v677_v33  ;;  %708 = vst [vmem:[#allocation2 + $0x10] sm:$0xf] %v677_v33 }
 0x212   : > { %v2042_v35 = vpop.f32.mrf.mxu1 }
 0x213   : > { %709 = vst [vmem:[#allocation2 + $0x30] sm:$0xf] %v700_v34  ;;  %v703_v36 = vcombine.high %v2042_v35, %v2042_v35  ;;  %714 = vst [vmem:[#allocation2 + $0xd0] sm:$0xf] %v2042_v35 }
 0x214   : > { %v687_v37 = vpop.f32.mrf.mxu1 }
 0x215   : > { %715 = vst [vmem:[#allocation2 + $0xf0] sm:$0xf] %v703_v36  ;;  %v702_v38 = vcombine.high %v687_v37, %v687_v37  ;;  %712 = vst [vmem:[#allocation2 + $0x90] sm:$0xf] %v687_v37 }
 0x216   : > { %v1116_v57 = vld [vmem:[#allocation2 + $0x50] sm:$0xff] }
 0x217   : > { %713 = vst [vmem:[#allocation2 + $0xb0] sm:$0xf] %v702_v38 }
 0x218   : > { %v952_v48 = vld [vmem:[#allocation2 + $0x10] sm:$0xff] }
 0x219   : > { %v1196_v60 = vld [vmem:[#allocation2 + $0x70] sm:$0xff] }
 0x21a   : > { %v1036_v51 = vld [vmem:[#allocation2 + $0x30] sm:$0xff] }
 0x21b   : > { %v1436_v9 = vld [vmem:[#allocation2 + $0xd0] sm:$0xff] }
 0x21c   : > { %v1276_v1 = vld [vmem:[#allocation2 + $0x90] sm:$0xff] }
 0x21d   : > { %v1516_v12 = vld [vmem:[#allocation2 + $0xf0] sm:$0xff] }
 0x21e   : > { %v1356_v4 = vld [vmem:[#allocation2 + $0xb0] sm:$0xff] }
 0x22e   : > { %v2115_v39 = vpop.f32.mrf.mxu1 }
 0x22f   : > { %v928_v40 = vcombine.high %v2115_v39, %v2115_v39  ;;  %937 = vst [vmem:[#allocation2 + $0x58] sm:$0xf] %v2115_v39 }
 0x230   : > { %v904_v41 = vpop.f32.mrf.mxu1 }
 0x231   : > { %938 = vst [vmem:[#allocation2 + $0x78] sm:$0xf] %v928_v40  ;;  %v927_v42 = vcombine.high %v904_v41, %v904_v41  ;;  %935 = vst [vmem:[#allocation2 + $0x18] sm:$0xf] %v904_v41 }
 0x232   : > { %v2118_v43 = vpop.f32.mrf.mxu1 }
 0x233   : > { %936 = vst [vmem:[#allocation2 + $0x38] sm:$0xf] %v927_v42  ;;  %v930_v44 = vcombine.high %v2118_v43, %v2118_v43  ;;  %941 = vst [vmem:[#allocation2 + $0xd8] sm:$0xf] %v2118_v43 }
 0x234   : > { %v914_v45 = vpop.f32.mrf.mxu1 }
 0x235   : > { %942 = vst [vmem:[#allocation2 + $0xf8] sm:$0xf] %v930_v44  ;;  %v929_v46 = vcombine.high %v914_v45, %v914_v45  ;;  %939 = vst [vmem:[#allocation2 + $0x98] sm:$0xf] %v914_v45 }
 0x236   : > { %v1117_v56 = vld [vmem:[#allocation2 + $0x58] sm:$0xf] }
 0x237   : > { %940 = vst [vmem:[#allocation2 + $0xb8] sm:$0xf] %v929_v46 }
 0x238   : > { %v953_v47 = vld [vmem:[#allocation2 + $0x18] sm:$0xf] }
 0x239   : > { %2120 = vmatpush3.msk.msra.mxu0 %vm958_vm1, %v953_v47  ;;  %v1197_v58 = vld [vmem:[#allocation2 + $0x78] sm:$0xf] }
 0x23a   : > { %2121 = vmatprep.subr.mxu0 %v2408_v20  ;;  %v1037_v49 = vld [vmem:[#allocation2 + $0x38] sm:$0xf] }
 0x23b   : > { %2122 = vmatpush3.msra.mxu0 %v952_v48  ;;  %2131 = vmatpush3.msk.msra.mxu1 %vm958_vm1, %v1037_v49  ;;  %v1437_v8 = vld [vmem:[#allocation2 + $0xd8] sm:$0xf] }
 0x23c   : > { %2123 = vmatprep.subr.mxu0 %v2408_v20  ;;  %2132 = vmatprep.subr.mxu1 %v2408_v20  ;;  %v1277_v0 = vld [vmem:[#allocation2 + $0x98] sm:$0xf] }
 0x23d   : > { %2124 = vmatpush3.msra.mxu0 %v951_v50  ;;  %2133 = vmatpush3.msra.mxu1 %v1036_v51  ;;  %v1517_v10 = vld [vmem:[#allocation2 + $0xf8] sm:$0xf] }
 0x23e   : > { %2125 = vmatprep.subr.mxu0 %v2408_v20  ;;  %2134 = vmatprep.subr.mxu1 %v2408_v20  ;;  %v1357_v2 = vld [vmem:[#allocation2 + $0xb8] sm:$0xf] }
 0x23f   : > { %2126 = vmatpush3.msra.mxu0 %v950_v52  ;;  %2135 = vmatpush3.msra.mxu1 %v1035_v53 }
 0x240   : > { %2136 = vmatprep.subr.mxu1 %v2408_v20  ;;  %2141 = vmatprep.subr.mxu0 %v2408_v20 }
 0x241   : > { %2128 = vmatmul.mubr.msk.f32.vlgmr.msra.gmra.mxu0 %vm954_vm2, %v2832_v54  ;;  %2137 = vmatpush3.msra.mxu1 %v1034_v55 }
 0x242   : > { %2142 = vmatpush3.msk.msra.mxu0 %vm958_vm1, %v1117_v56  ;;  %2139 = vmatmul.mubr.msk.f32.vlgmr.msra.gmra.mxu1 %vm954_vm2, %v2832_v54 }
 0x243   : > { %2143 = vmatprep.subr.mxu0 %v2408_v20  ;;  %2152 = vmatprep.subr.mxu1 %v2408_v20 }
 0x244   : > { %2144 = vmatpush3.msra.mxu0 %v1116_v57  ;;  %2153 = vmatpush3.msk.msra.mxu1 %vm958_vm1, %v1197_v58 }
 0x245   : > { %2145 = vmatprep.subr.mxu0 %v2408_v20  ;;  %2154 = vmatprep.subr.mxu1 %v2408_v20 }
 0x246   : > { %2146 = vmatpush3.msra.mxu0 %v1115_v59  ;;  %2155 = vmatpush3.msra.mxu1 %v1196_v60 }
 0x247   : > { %2147 = vmatprep.subr.mxu0 %v2408_v20  ;;  %2156 = vmatprep.subr.mxu1 %v2408_v20 }
 0x248   : > { %2148 = vmatpush3.msra.mxu0 %v1114_v61  ;;  %2157 = vmatpush3.msra.mxu1 %v1195_v62 }
 0x249   : > { %2149 = vmatprep.mubr.msk.f32.mxu0 %vm2409_vm0, %v2408_v20  ;;  %2158 = vmatprep.subr.mxu1 %v2408_v20 }
 0x24a   : > { %2163 = vmatprep.subr.mxu0 %v2408_v20  ;;  %2150 = vmatmul.mubr.msk.f32.vlgmr.msra.gmra.mxu0 %vm954_vm2, %v2832_v54 }
 0x24b   : > { %2159 = vmatpush3.msra.mxu1 %v1194_v63  ;;  %2160 = vmatprep.mubr.msk.f32.mxu1 %vm2409_vm0, %v2408_v20 }
 0x24c   : > { %2164 = vmatpush3.msk.msra.mxu0 %vm958_vm1, %v1277_v0  ;;  %2161 = vmatmul.mubr.msk.f32.vlgmr.msra.gmra.mxu1 %vm954_vm2, %v2832_v54 }
 0x24d   : > { %2165 = vmatprep.subr.mxu0 %v2408_v20  ;;  %2174 = vmatprep.subr.mxu1 %v2408_v20 }
 0x24e   : > { %2166 = vmatpush3.msra.mxu0 %v1276_v1  ;;  %2175 = vmatpush3.msk.msra.mxu1 %vm958_vm1, %v1357_v2 }
 0x24f   : > { %2167 = vmatprep.subr.mxu0 %v2408_v20  ;;  %2176 = vmatprep.subr.mxu1 %v2408_v20 }
 0x250   : > { %2168 = vmatpush3.msra.mxu0 %v1275_v3  ;;  %2177 = vmatpush3.msra.mxu1 %v1356_v4 }
 0x251   : > { %2169 = vmatprep.subr.mxu0 %v2408_v20  ;;  %2178 = vmatprep.subr.mxu1 %v2408_v20 }
 0x252   : > { %2170 = vmatpush3.msra.mxu0 %v1274_v5  ;;  %2179 = vmatpush3.msra.mxu1 %v1355_v6 }
 0x253   : > { %2171 = vmatprep.mubr.msk.f32.mxu0 %vm2409_vm0, %v2408_v20  ;;  %2180 = vmatprep.subr.mxu1 %v2408_v20 }
 0x254   : > { %2185 = vmatprep.subr.mxu0 %v2408_v20  ;;  %2172 = vmatmul.mubr.msk.f32.vlgmr.msra.gmra.mxu0 %vm954_vm2, %v2832_v54 }
 0x255   : > { %2181 = vmatpush3.msra.mxu1 %v1354_v7  ;;  %2182 = vmatprep.mubr.msk.f32.mxu1 %vm2409_vm0, %v2408_v20 }
 0x256   : > { %2186 = vmatpush3.msk.msra.mxu0 %vm958_vm1, %v1437_v8  ;;  %2183 = vmatmul.mubr.msk.f32.vlgmr.msra.gmra.mxu1 %vm954_vm2, %v2832_v54 }
 0x257   : > { %2187 = vmatprep.subr.mxu0 %v2408_v20  ;;  %2196 = vmatprep.subr.mxu1 %v2408_v20 }
 0x258   : > { %2188 = vmatpush3.msra.mxu0 %v1436_v9  ;;  %2197 = vmatpush3.msk.msra.mxu1 %vm958_vm1, %v1517_v10 }
 0x259   : > { %2189 = vmatprep.subr.mxu0 %v2408_v20  ;;  %2198 = vmatprep.subr.mxu1 %v2408_v20 }
 0x25a   : > { %2190 = vmatpush3.msra.mxu0 %v1435_v11  ;;  %2199 = vmatpush3.msra.mxu1 %v1516_v12 }
 0x25b   : > { %2191 = vmatprep.subr.mxu0 %v2408_v20  ;;  %2200 = vmatprep.subr.mxu1 %v2408_v20 }
 0x25c   : > { %2192 = vmatpush3.msra.mxu0 %v1434_v13  ;;  %2193 = vmatprep.mubr.msk.f32.mxu0 %vm2409_vm0, %v2408_v20 }
 0x25d   : > { %2201 = vmatpush3.msra.mxu1 %v1515_v14  ;;  %2194 = vmatmul.mubr.msk.f32.vlgmr.msra.gmra.mxu0 %vm954_vm2, %v2832_v54 }
 0x25e   : > { %2202 = vmatprep.subr.mxu1 %v2408_v20  ;;  %2204 = vmatprep.mubr.msk.f32.mxu1 %vm2409_vm0, %v2408_v20 }
 0x25f   : > { %2203 = vmatpush3.msra.mxu1 %v1514_v15 }
 0x260   : > { %2205 = vmatmul.mubr.msk.f32.vlgmr.msra.gmra.mxu1 %vm954_vm2, %v2832_v54 }
 0x301   : > { %v1028_v17 = vpop.f32.mrf.mxu0 }
 0x302   : > { %v1107_v18 = vpop.f32.mrf.mxu1  ;;  %v1029_v19 = vadd.f32 %v1028_v17, %v948_v16 }
 0x303   : > { %v1108_v21 = vadd.f32 %v1107_v18, %v948_v16  ;;  %v2129_v22 = vpop.f32.mrf.mxu0 }
 0x304   : > { %1032 = vst [vmem:[%s2894_s29] sm:$0xff] %v1029_v19  ;;  %v2140_v20 = vpop.f32.mrf.mxu1 }
 0x305   : > { %1705 = vst [vmem:[%s2894_s29 + $0x8] sm:$0xff] %v1108_v21 }
 0x30a   : > { %v1187_v23 = vpop.f32.mrf.mxu0 }
 0x30b   : > { %v1188_v24 = vadd.f32 %v1187_v23, %v948_v16 }
 0x30c   : > { %v1267_v25 = vpop.f32.mrf.mxu1  ;;  %v2151_v26 = vpop.f32.mrf.mxu0 }
 0x30d   : > { %1708 = vst [vmem:[%s2894_s29 + $0x10] sm:$0xff] %v1188_v24  ;;  %v1268_v27 = vadd.f32 %v1267_v25, %v948_v16 }
 0x30e   : > { %v2162_v28 = vpop.f32.mrf.mxu1 }
 0x30f   : > { %1711 = vst [vmem:[%s2894_s29 + $0x18] sm:$0xff] %v1268_v27 }
 0x314   : > { %v1347_v29 = vpop.f32.mrf.mxu0 }
 0x315   : > { %v1348_v30 = vadd.f32 %v1347_v29, %v948_v16 }
 0x316   : > { %v1427_v31 = vpop.f32.mrf.mxu1  ;;  %v2173_v32 = vpop.f32.mrf.mxu0 }
 0x317   : > { %1714 = vst [vmem:[%s2894_s29 + $0x20] sm:$0xff] %v1348_v30  ;;  %v1428_v33 = vadd.f32 %v1427_v31, %v948_v16 }
 0x318   : > { %v2184_v34 = vpop.f32.mrf.mxu1 }
 0x319   : > { %1717 = vst [vmem:[%s2894_s29 + $0x28] sm:$0xff] %v1428_v33 }
 0x31d   : > { %v1507_v35 = vpop.f32.mrf.mxu0 }
 0x31e   : > { %v1508_v36 = vadd.f32 %v1507_v35, %v948_v16 }
 0x31f   : > { %v2195_v37 = vpop.f32.mrf.mxu0 }
 0x320   : > { %1720 = vst [vmem:[%s2894_s29 + $0x30] sm:$0xff] %v1508_v36  ;;  %v1587_v38 = vpop.f32.mrf.mxu1 }
 0x321   : > { %v1588_v39 = vadd.f32 %v1587_v38, %v948_v16 }
 0x322   : > { %v2206_v40 = vpop.f32.mrf.mxu1 }
 0x323   : > { %1723 = vst [vmem:[%s2894_s29 + $0x38] sm:$0xff] %v1588_v39 }
 0x324   : > { %2345 = shalt.err (!%p2342_p0)
}
 0x325   : > { %s2346_s8 = scalar_lea.hbm %s2908_s20, 1024  ;;  %s2350_s24 = scalar_lea.hbm %s2958_s4, 2048 }
 0x326   : > { %p2347_p5 = scmp.ne.s32.totalorder %s2908_s20, %s2346_s8  ;;  %p2351_p4 = scmp.lt.s32.totalorder %s2908_s20, %s2958_s4 }
 0x327   : > { %p2352_p6 = scmp.lt.s32.totalorder %s2350_s24, %s2346_s8 }
 0x328   : > { %p2348_p9 = pnand %p2347_p5, %p2974_p11 }
 0x329   : > { %p2353_p8 = por %p2352_p6, %p2351_p4 }
 0x32a   : > { %p2349_p1 = pneg %p2348_p9 }
 0x32c   : > { %p2354_p3 = pnand %p2353_p8, %p2349_p1 }
 0x32e   : > { %2357 = shalt.err (!%p2354_p3)
}
 0x32f   : > { %s2412_s29 = smov 128   ;;  %s2413_s12 = smov 8  }
 0x330   : > { %2213 = dma.vmem_to_hbm [thread:$0]  (%p2974_p11), %s2910_s11, 1024, %s2908_s20, %s1594_s25, %s2412_s29, %s2412_s29, %s2413_s12  }
 0x331 PF: > { %s1622_s13 = sand.u32 1, %s2388_s15   ;;  %p2975_p7 = scmp.ne.s32.totalorder %s2964_s22, 0 }
 0x332   : > { %p2976_p12 = scmp.ge.s32.totalorder %s2400_s18, 2  ;;  %s1623_s14 = scalar_lea.sflag [#allocation5], %s1622_s13 }
 0x334   : > { %p2224_p10 = pnand %p2976_p12, %p2975_p7 }
 0x336   : > { %p2225_p2 = pneg %p2224_p10 }
 0x338   : > { %2383 = dma.done.wait (%p2225_p2), %s1623_s14, 1024  }
 0x339   : > { %2385 = vsyncadd (%p2225_p2), %s1623_s14, 4294966272  ;;  %p18_p13 = scmp.ge.s32.totalorder %s2493_s27, 4   ;;  %s2977_s15 = smov %s2392_s16 }
 0x33a   : > { %s2978_s16 = smov %s2396_s17  ;;  %s2979_s17 = smov %s2510_s9 }
 0x33b   : > { %s2980_s18 = smov %s2493_s27  ;;  %20 = sbr.rel (!%p18_p13) target bundleno = 6 (0x6), region = 101 }
 0x340   :  { %1628 = vsyncpa [#allocation4], 1 }
 0x341   :  { %1630 = vsyncpa [#allocation4 + $0x1], 1 }
 0x342   :  { %1631 = vsyncpa [#allocation7], 1 }
 0x343   :  { %1632 = vsyncpa [#allocation5], 1 }
 0x344   :  { %1634 = vsyncpa [#allocation5 + $0x1], 1 }

</bundles_post_ra>
